<compile_context>
chip_gen: v5e
topology: v5e:2x2
jax: 0.10.0
libtpu: 0.0.40
codegen_flags: <defaults>
</compile_context>

<pallas_src>
import math
import functools

import numpy as np
import jax
import jax.numpy as jnp
from jax.experimental import pallas as pl
from jax.experimental.pallas import tpu as pltpu


def _position_matrix(kernel_size, position):
    """Mirror of the PyTorch __init__ positional (gaussian) kernel (reference only)."""
    if position:
        X, Y = np.meshgrid(np.arange(kernel_size), np.arange(kernel_size), indexing="ij")
        r = np.concatenate((X[:, :, None], Y[:, :, None]), 2) - np.array(
            [int(kernel_size / 2), int(kernel_size / 2)]
        )
        r = np.exp(-np.linalg.norm(r, axis=2))
        return r.astype(np.float32)
    return np.zeros((kernel_size, kernel_size), np.float32)


def _msa_kernel(x_ref, wv_ref, o_ref, v_ref, *,
                H, W, pad, groups, mid, cin_g, c_in, c_out, bt):
    """One batch tile (bt batches, all groups).

    x_ref : (bt*C_in,  H*W)  input; (batch, channel) rows on sublanes, H*W on lanes
    wv_ref: (C_out, cin_g)   grouped 1x1 value-conv weight (rows group-major)
    o_ref : (bt*C_out, H*W)
    v_ref : (bt*C_out, H*W)  f32 scratch holding the value-conv result
    """
    HW = H * W
    x = x_ref[...].astype(jnp.float32)        # (bt*C_in, HW)
    wv = wv_ref[...].astype(jnp.float32)      # (C_out, cin_g)

    # --- grouped 1x1 value conv (fused VPU MAC).  cin_g is tiny (2-4), so the MXU
    # would be <2% utilized; this also keeps HBM reads at C_in*HW, not C_out*HW.
    # TODO(synk): switch to jnp.dot(..., preferred_element_type=jnp.float32) on the
    # MXU once cin_g grows past ~16-32.
    for b in range(bt):
        for g in range(groups):
            xg = x[b * c_in + g * cin_g: b * c_in + (g + 1) * cin_g, :]   # (cin_g, HW)
            wg = wv[g * mid:(g + 1) * mid, :]                             # (mid, cin_g)
            vg = wg[:, 0:1] * xg[0:1, :]
            for c in range(1, cin_g):
                vg = vg + wg[:, c:c + 1] * xg[c:c + 1, :]
            v_ref[b * c_out + g * mid: b * c_out + (g + 1) * mid, :] = vg
    v = v_ref[...]                            # (bt*C_out, HW), f32, full 8-row tiles

    # --- separable k*k zero-padded box sum (q/k/softmax/positional path of the
    # reference is dead math: softmax over a size-1 axis == 1.0).
    # Analytic validity masks, hoisted once at (1, HW); only the data roll remains
    # per (distance, direction).  pltpu.roll follows jnp.roll semantics:
    # roll(a, s)[j] == a[j - s], so roll(+d) fetches the "behind" neighbour and
    # roll(HW - d) the "ahead" neighbour.
    lane = jax.lax.broadcasted_iota(jnp.int32, (1, HW), 1)
    col = lane % W
    take_behind = [col >= d for d in range(1, pad + 1)]              # w - d in row
    take_ahead = [col < (W - d) for d in range(1, pad + 1)]          # w + d in row
    take_up = [lane >= d * W for d in range(1, pad + 1)]             # h - d in image
    take_down = [lane < (HW - d * W) for d in range(1, pad + 1)]     # h + d in image

    # TODO(synk): for pad >= 3 restructure each pass as a doubling tree of rolls
    # (O(log k) XLU rolls instead of O(k)).
    acc = v
    for d in range(1, pad + 1):
        acc = acc + jnp.where(take_behind[d - 1], pltpu.roll(v, d, axis=1), 0.0)
        acc = acc + jnp.where(take_ahead[d - 1], pltpu.roll(v, HW - d, axis=1), 0.0)
    rows = acc                                 # W-direction window done
    out = rows
    for d in range(1, pad + 1):
        out = out + jnp.where(take_up[d - 1], pltpu.roll(rows, d * W, axis=1), 0.0)
        out = out + jnp.where(take_down[d - 1], pltpu.roll(rows, HW - d * W, axis=1), 0.0)

    o_ref[...] = out.astype(o_ref.dtype)


def _pick_batch_tile(B, c_in, c_out, HW):
    """Largest batch tile with 8-aligned sublane rows inside a conservative VMEM budget."""
    budget = 6 * 1024 * 1024   # bytes of per-step working set; headroom for v7x (64 MiB)
    best_aligned = None
    for bt in range(1, B + 1):
        if B % bt:
            continue
        work = (2 * bt * c_in + 8 * bt * c_out) * HW * 4
        if work > budget:
            break
        if (bt * c_in) % 8 == 0 and (bt * c_out) % 8 == 0:
            best_aligned = bt
    if best_aligned is not None:
        return best_aligned
    # Fall back to one full-array block (always a legal BlockSpec).
    # TODO(synk): add a channel (mid) grid axis instead when B*C_out*HW*4 is too big.
    return B


def multi_headed_spatial_attention(x, wq, wk, wv, *, kernel_size, groups,
                                   stride=1, padding=0, dilation=1, position=True,
                                   batch_tile=None):
    """Pallas implementation of MultiHeadedSpatialAttention.forward.

    x          : (B, C_in, H, W)  NCHW
    wq, wk, wv : (C_out, C_in // groups)  grouped 1x1 conv weights (squeezed).
                 wq / wk / position are accepted for API parity but cannot affect
                 the output (the reference softmax is over a size-1 axis == 1.0).
    returns    : (B, C_out, H, W)
    """
    del wq, wk, position  # mathematically dead in the reference forward
    B, C_in, H, W = x.shape
    C_out = wv.shape[0]
    mid = C_out // groups
    cin_g = C_in // groups
    k = kernel_size
    p = padding

    # The PyTorch module's .view() only type-checks when unfold yields H*W
    # locations: stride=1, dilation=1, padding=k//2 with odd k, and H, W >= k.
    assert stride == 1 and dilation == 1 and k % 2 == 1 and p == k // 2, \
        "only stride=1, dilation=1, padding=kernel_size//2 supported"
    assert H >= k and W >= k, "spatial dims must be >= kernel_size"

    HW = H * W
    # TODO(synk): if HW % 128 != 0 at production sizes, pad the flattened spatial
    # axis to a multiple of 128 in the wrapper so stores stay lane-dense.

    bt = batch_tile if batch_tile is not None else _pick_batch_tile(B, C_in, C_out, HW)
    assert B % bt == 0

    # Pure contiguous views -- no transpose / pad / extra HBM traffic.  Folding
    # (batch, channel) onto the sublane axis gives full (8,128) tiles.
    x2 = x.reshape(B * C_in, HW)
    wv2 = wv.reshape(C_out, cin_g)

    kern = functools.partial(_msa_kernel, H=H, W=W, pad=p, groups=groups, mid=mid,
                             cin_g=cin_g, c_in=C_in, c_out=C_out, bt=bt)

    # Explicit VMEM budget: double-buffered blocks + f32 scratch + intermediates,
    # with margin, floored at the 32 MiB scoped default, capped under v7x's 64 MiB.
    blk_bytes = (bt * C_in + bt * C_out) * HW * x.dtype.itemsize
    interm_bytes = 7 * bt * C_out * HW * 4
    vmem_limit = int(min(64 * 1024 * 1024,
                         max(2 * (2 * blk_bytes + interm_bytes), 32 * 1024 * 1024)))

    out = pl.pallas_call(
        kern,
        out_shape=jax.ShapeDtypeStruct((B * C_out, HW), x.dtype),
        # One parallel batch-tile axis; at production B this has >=2 steps so both
        # v7x TensorCores get work (tiny demo sizes collapse it to a single step).
        grid=(B // bt,),
        in_specs=[
            pl.BlockSpec((bt * C_in, HW), lambda i: (i, 0)),
            pl.BlockSpec((C_out, cin_g), lambda i: (0, 0)),   # tiny; stays resident
        ],
        out_specs=pl.BlockSpec((bt * C_out, HW), lambda i: (i, 0)),
        scratch_shapes=[pltpu.VMEM((bt * C_out, HW), jnp.float32)],
        compiler_params=pltpu.CompilerParams(
            dimension_semantics=("parallel",),
            vmem_limit_bytes=vmem_limit),
    )(x2, wv2)

    # (B*C_out, H*W) -> (B, C_out, H, W): contiguous reshape, free.
    return out.reshape(B, C_out, H, W)


def _reference(x, wq, wk, wv, kernel_size, groups, padding, position=True):
    """Pure-JAX mirror of the full PyTorch forward (q/k/softmax/pos included)."""
    B, C_in, H, W = x.shape
    C_out = wq.shape[0]
    mid = C_out // groups
    cin_g = C_in // groups
    pos = _position_matrix(kernel_size, position)

    def conv(w):
        xg = x.reshape(B, groups, cin_g, H, W)
        wg = w.reshape(groups, mid, cin_g)
        return jnp.einsum("bgchw,gmc->bgmhw", xg, wg)

    q, kk, v = conv(wq), conv(wk), conv(wv)
    p = padding
    kp = jnp.pad(kk, ((0, 0), (0, 0), (0, 0), (p, p), (p, p)))
    vp = jnp.pad(v, ((0, 0), (0, 0), (0, 0), (p, p), (p, p)))
    out = jnp.zeros((B, groups, mid, H, W), jnp.float32)
    for i in range(kernel_size):
        for j in range(kernel_size):
            ks = kp[..., i:i + H, j:j + W]
            vs = vp[..., i:i + H, j:j + W]
            s = jnp.sum(q * (ks + pos[i, j]), axis=2, keepdims=True)
            sim = jax.nn.softmax(s, axis=2)      # softmax over size-1 axis (== 1)
            out = out + sim * vs
    return out.reshape(B, C_out, H, W)


if __name__ == "__main__":
    B, C_in, H, W = 2, 4, 16, 16
    C_out, groups, ksize = 8, 2, 3
    padding = ksize // 2
    cin_g = C_in // groups

    key = jax.random.PRNGKey(0)
    kx, kq, kkey, kv = jax.random.split(key, 4)
    x = jax.random.normal(kx, (B, C_in, H, W), jnp.float32)
    bound = 1.0 / math.sqrt(cin_g)   # nn.Conv2d-style uniform init bound
    wq = jax.random.uniform(kq, (C_out, cin_g), jnp.float32, -bound, bound)
    wk = jax.random.uniform(kkey, (C_out, cin_g), jnp.float32, -bound, bound)
    wv = jax.random.uniform(kv, (C_out, cin_g), jnp.float32, -bound, bound)

    out = multi_headed_spatial_attention(
        x, wq, wk, wv, kernel_size=ksize, groups=groups,
        stride=1, padding=padding, dilation=1, position=True)
    out = jax.block_until_ready(out)

    ref = _reference(x, wq, wk, wv, ksize, groups, padding, position=True)
    assert out.shape == (B, C_out, H, W)
    np.testing.assert_allclose(np.asarray(out), np.asarray(ref), rtol=1e-5, atol=1e-5)
    print("KERNEL_OK")
</pallas_src>

<mosaic_0001>
module attributes {stable_mosaic.version = 11 : i64} {
  func.func @_msa_kernel(%arg0: i32, %arg1: memref<8x256xf32, #tpu.memory_space<vmem>>, %arg2: memref<8x2xf32, #tpu.memory_space<vmem>>, %arg3: memref<16x256xf32, #tpu.memory_space<vmem>>, %arg4: memref<16x256xf32, #tpu.memory_space<vmem>>) attributes {dimension_semantics = [#tpu.dimension_semantics<parallel>], iteration_bounds = array<i64: 1>, scalar_prefetch = 0 : i64, scratch_operands = 1 : i64, tpu.core_type = #tpu.core_type<tc>, window_params = [{transform_indices = @transform_0, window_bounds = array<i64: 8, 256>}, {pipeline_mode = #tpu.pipeline_mode<synchronous>, transform_indices = @transform_1, window_bounds = array<i64: 8, 2>}, {transform_indices = @transform_2, window_bounds = array<i64: 16, 256>}]} {
    %c0 = arith.constant 0 : index
    %c0_0 = arith.constant 0 : index
    %0 = vector.load %arg1[%c0, %c0_0] : memref<8x256xf32, #tpu.memory_space<vmem>>, vector<8x256xf32>
    %c0_1 = arith.constant 0 : index
    %c0_2 = arith.constant 0 : index
    %1 = vector.load %arg2[%c0_1, %c0_2] : memref<8x2xf32, #tpu.memory_space<vmem>>, vector<8x2xf32>
    %2 = vector.extract_strided_slice %0 {offsets = [0, 0], sizes = [2, 256], strides = [1, 1]} : vector<8x256xf32> to vector<2x256xf32>
    %3 = vector.extract_strided_slice %1 {offsets = [0, 0], sizes = [4, 2], strides = [1, 1]} : vector<8x2xf32> to vector<4x2xf32>
    %4 = vector.extract_strided_slice %3 {offsets = [0, 0], sizes = [4, 1], strides = [1, 1]} : vector<4x2xf32> to vector<4x1xf32>
    %5 = vector.extract_strided_slice %2 {offsets = [0, 0], sizes = [1, 256], strides = [1, 1]} : vector<2x256xf32> to vector<1x256xf32>
    %6 = vector.broadcast %4 : vector<4x1xf32> to vector<4x256xf32>
    %7 = vector.broadcast %5 : vector<1x256xf32> to vector<4x256xf32>
    %8 = arith.mulf %6, %7 : vector<4x256xf32>
    %9 = vector.extract_strided_slice %3 {offsets = [0, 1], sizes = [4, 1], strides = [1, 1]} : vector<4x2xf32> to vector<4x1xf32>
    %10 = vector.extract_strided_slice %2 {offsets = [1, 0], sizes = [1, 256], strides = [1, 1]} : vector<2x256xf32> to vector<1x256xf32>
    %11 = vector.broadcast %9 : vector<4x1xf32> to vector<4x256xf32>
    %12 = vector.broadcast %10 : vector<1x256xf32> to vector<4x256xf32>
    %13 = arith.mulf %11, %12 : vector<4x256xf32>
    %14 = arith.addf %8, %13 : vector<4x256xf32>
    %c0_3 = arith.constant 0 : index
    %c0_4 = arith.constant 0 : index
    %15 = vector.load %arg4[%c0_3, %c0_4] : memref<16x256xf32, #tpu.memory_space<vmem>>, vector<4x256xf32>
    tpu.vector_store %arg4[%c0_3, %c0_4], %14 {strides = array<i32>} : memref<16x256xf32, #tpu.memory_space<vmem>>, vector<4x256xf32>,
    %16 = vector.extract_strided_slice %0 {offsets = [2, 0], sizes = [2, 256], strides = [1, 1]} : vector<8x256xf32> to vector<2x256xf32>
    %17 = vector.extract_strided_slice %1 {offsets = [4, 0], sizes = [4, 2], strides = [1, 1]} : vector<8x2xf32> to vector<4x2xf32>
    %18 = vector.extract_strided_slice %17 {offsets = [0, 0], sizes = [4, 1], strides = [1, 1]} : vector<4x2xf32> to vector<4x1xf32>
    %19 = vector.extract_strided_slice %16 {offsets = [0, 0], sizes = [1, 256], strides = [1, 1]} : vector<2x256xf32> to vector<1x256xf32>
    %20 = vector.broadcast %18 : vector<4x1xf32> to vector<4x256xf32>
    %21 = vector.broadcast %19 : vector<1x256xf32> to vector<4x256xf32>
    %22 = arith.mulf %20, %21 : vector<4x256xf32>
    %23 = vector.extract_strided_slice %17 {offsets = [0, 1], sizes = [4, 1], strides = [1, 1]} : vector<4x2xf32> to vector<4x1xf32>
    %24 = vector.extract_strided_slice %16 {offsets = [1, 0], sizes = [1, 256], strides = [1, 1]} : vector<2x256xf32> to vector<1x256xf32>
    %25 = vector.broadcast %23 : vector<4x1xf32> to vector<4x256xf32>
    %26 = vector.broadcast %24 : vector<1x256xf32> to vector<4x256xf32>
    %27 = arith.mulf %25, %26 : vector<4x256xf32>
    %28 = arith.addf %22, %27 : vector<4x256xf32>
    %c4 = arith.constant 4 : index
    %c0_5 = arith.constant 0 : index
    %29 = vector.load %arg4[%c4, %c0_5] : memref<16x256xf32, #tpu.memory_space<vmem>>, vector<4x256xf32>
    tpu.vector_store %arg4[%c4, %c0_5], %28 {strides = array<i32>} : memref<16x256xf32, #tpu.memory_space<vmem>>, vector<4x256xf32>,
    %30 = vector.extract_strided_slice %0 {offsets = [4, 0], sizes = [2, 256], strides = [1, 1]} : vector<8x256xf32> to vector<2x256xf32>
    %31 = vector.extract_strided_slice %1 {offsets = [0, 0], sizes = [4, 2], strides = [1, 1]} : vector<8x2xf32> to vector<4x2xf32>
    %32 = vector.extract_strided_slice %31 {offsets = [0, 0], sizes = [4, 1], strides = [1, 1]} : vector<4x2xf32> to vector<4x1xf32>
    %33 = vector.extract_strided_slice %30 {offsets = [0, 0], sizes = [1, 256], strides = [1, 1]} : vector<2x256xf32> to vector<1x256xf32>
    %34 = vector.broadcast %32 : vector<4x1xf32> to vector<4x256xf32>
    %35 = vector.broadcast %33 : vector<1x256xf32> to vector<4x256xf32>
    %36 = arith.mulf %34, %35 : vector<4x256xf32>
    %37 = vector.extract_strided_slice %31 {offsets = [0, 1], sizes = [4, 1], strides = [1, 1]} : vector<4x2xf32> to vector<4x1xf32>
    %38 = vector.extract_strided_slice %30 {offsets = [1, 0], sizes = [1, 256], strides = [1, 1]} : vector<2x256xf32> to vector<1x256xf32>
    %39 = vector.broadcast %37 : vector<4x1xf32> to vector<4x256xf32>
    %40 = vector.broadcast %38 : vector<1x256xf32> to vector<4x256xf32>
    %41 = arith.mulf %39, %40 : vector<4x256xf32>
    %42 = arith.addf %36, %41 : vector<4x256xf32>
    %c8 = arith.constant 8 : index
    %c0_6 = arith.constant 0 : index
    %43 = vector.load %arg4[%c8, %c0_6] : memref<16x256xf32, #tpu.memory_space<vmem>>, vector<4x256xf32>
    tpu.vector_store %arg4[%c8, %c0_6], %42 {strides = array<i32>} : memref<16x256xf32, #tpu.memory_space<vmem>>, vector<4x256xf32>,
    %44 = vector.extract_strided_slice %0 {offsets = [6, 0], sizes = [2, 256], strides = [1, 1]} : vector<8x256xf32> to vector<2x256xf32>
    %45 = vector.extract_strided_slice %1 {offsets = [4, 0], sizes = [4, 2], strides = [1, 1]} : vector<8x2xf32> to vector<4x2xf32>
    %46 = vector.extract_strided_slice %45 {offsets = [0, 0], sizes = [4, 1], strides = [1, 1]} : vector<4x2xf32> to vector<4x1xf32>
    %47 = vector.extract_strided_slice %44 {offsets = [0, 0], sizes = [1, 256], strides = [1, 1]} : vector<2x256xf32> to vector<1x256xf32>
    %48 = vector.broadcast %46 : vector<4x1xf32> to vector<4x256xf32>
    %49 = vector.broadcast %47 : vector<1x256xf32> to vector<4x256xf32>
    %50 = arith.mulf %48, %49 : vector<4x256xf32>
    %51 = vector.extract_strided_slice %45 {offsets = [0, 1], sizes = [4, 1], strides = [1, 1]} : vector<4x2xf32> to vector<4x1xf32>
    %52 = vector.extract_strided_slice %44 {offsets = [1, 0], sizes = [1, 256], strides = [1, 1]} : vector<2x256xf32> to vector<1x256xf32>
    %53 = vector.broadcast %51 : vector<4x1xf32> to vector<4x256xf32>
    %54 = vector.broadcast %52 : vector<1x256xf32> to vector<4x256xf32>
    %55 = arith.mulf %53, %54 : vector<4x256xf32>
    %56 = arith.addf %50, %55 : vector<4x256xf32>
    %c12 = arith.constant 12 : index
    %c0_7 = arith.constant 0 : index
    %57 = vector.load %arg4[%c12, %c0_7] : memref<16x256xf32, #tpu.memory_space<vmem>>, vector<4x256xf32>
    tpu.vector_store %arg4[%c12, %c0_7], %56 {strides = array<i32>} : memref<16x256xf32, #tpu.memory_space<vmem>>, vector<4x256xf32>,
    %c0_8 = arith.constant 0 : index
    %c0_9 = arith.constant 0 : index
    %58 = vector.load %arg4[%c0_8, %c0_9] : memref<16x256xf32, #tpu.memory_space<vmem>>, vector<16x256xf32>
    %59 = tpu.iota {dimensions = array<i32: 1>} : vector<1x256xi32>
    %c16_i32 = arith.constant 16 : i32
    %c0_i32 = arith.constant 0 : i32
    %60 = arith.cmpi eq, %c16_i32, %c0_i32 : i32
    %c1_i32 = arith.constant 1 : i32
    %61 = arith.select %60, %c1_i32, %c16_i32 : i32
    %62 = vector.broadcast %61 : i32 to vector<1x256xi32>
    %63 = arith.remsi %59, %62 : vector<1x256xi32>
    %c0_i32_10 = arith.constant 0 : i32
    %64 = vector.broadcast %c0_i32_10 : i32 to vector<1x256xi32>
    %65 = arith.cmpi ne, %63, %64 : vector<1x256xi32>
    %c0_i32_11 = arith.constant 0 : i32
    %66 = vector.broadcast %c0_i32_11 : i32 to vector<1x256xi32>
    %67 = arith.cmpi slt, %63, %66 : vector<1x256xi32>
    %c0_i32_12 = arith.constant 0 : i32
    %68 = arith.cmpi slt, %61, %c0_i32_12 : i32
    %69 = vector.broadcast %68 : i1 to vector<1x256xi1>
    %70 = vector.broadcast %69 : vector<1x256xi1> to vector<1x256xi1>
    %71 = arith.xori %67, %70 : vector<1x256xi1>
    %72 = arith.andi %71, %65 : vector<1x256xi1>
    %73 = vector.broadcast %61 : i32 to vector<1x256xi32>
    %74 = arith.addi %63, %73 : vector<1x256xi32>
    %75 = arith.select %72, %74, %63 : vector<1x256xi1>, vector<1x256xi32>
    %c1_i32_13 = arith.constant 1 : i32
    %76 = vector.broadcast %c1_i32_13 : i32 to vector<1x256xi32>
    %77 = arith.cmpi sge, %75, %76 : vector<1x256xi32>
    %c15_i32 = arith.constant 15 : i32
    %78 = vector.broadcast %c15_i32 : i32 to vector<1x256xi32>
    %79 = arith.cmpi slt, %75, %78 : vector<1x256xi32>
    %c16_i32_14 = arith.constant 16 : i32
    %80 = vector.broadcast %c16_i32_14 : i32 to vector<1x256xi32>
    %81 = arith.cmpi sge, %59, %80 : vector<1x256xi32>
    %c240_i32 = arith.constant 240 : i32
    %82 = vector.broadcast %c240_i32 : i32 to vector<1x256xi32>
    %83 = arith.cmpi slt, %59, %82 : vector<1x256xi32>
    %c1_i32_15 = arith.constant 1 : i32
    %84 = tpu.dynamic_rotate %58 by %c1_i32_15 dim 1 : vector<16x256xf32>, i32 -> vector<16x256xf32>
    %cst = arith.constant 0.000000e+00 : f32
    %85 = vector.shape_cast %77 : vector<1x256xi1> to vector<1x256xi1>
    %86 = vector.broadcast %85 : vector<1x256xi1> to vector<16x256xi1>
    %87 = vector.broadcast %cst : f32 to vector<16x256xf32>
    %88 = arith.select %86, %84, %87 : vector<16x256xi1>, vector<16x256xf32>
    %89 = arith.addf %58, %88 : vector<16x256xf32>
    %c255_i32 = arith.constant 255 : i32
    %90 = tpu.dynamic_rotate %58 by %c255_i32 dim 1 : vector<16x256xf32>, i32 -> vector<16x256xf32>
    %cst_16 = arith.constant 0.000000e+00 : f32
    %91 = vector.shape_cast %79 : vector<1x256xi1> to vector<1x256xi1>
    %92 = vector.broadcast %91 : vector<1x256xi1> to vector<16x256xi1>
    %93 = vector.broadcast %cst_16 : f32 to vector<16x256xf32>
    %94 = arith.select %92, %90, %93 : vector<16x256xi1>, vector<16x256xf32>
    %95 = arith.addf %89, %94 : vector<16x256xf32>
    %c16_i32_17 = arith.constant 16 : i32
    %96 = tpu.dynamic_rotate %95 by %c16_i32_17 dim 1 : vector<16x256xf32>, i32 -> vector<16x256xf32>
    %cst_18 = arith.constant 0.000000e+00 : f32
    %97 = vector.shape_cast %81 : vector<1x256xi1> to vector<1x256xi1>
    %98 = vector.broadcast %97 : vector<1x256xi1> to vector<16x256xi1>
    %99 = vector.broadcast %cst_18 : f32 to vector<16x256xf32>
    %100 = arith.select %98, %96, %99 : vector<16x256xi1>, vector<16x256xf32>
    %101 = arith.addf %95, %100 : vector<16x256xf32>
    %c240_i32_19 = arith.constant 240 : i32
    %102 = tpu.dynamic_rotate %95 by %c240_i32_19 dim 1 : vector<16x256xf32>, i32 -> vector<16x256xf32>
    %cst_20 = arith.constant 0.000000e+00 : f32
    %103 = vector.shape_cast %83 : vector<1x256xi1> to vector<1x256xi1>
    %104 = vector.broadcast %103 : vector<1x256xi1> to vector<16x256xi1>
    %105 = vector.broadcast %cst_20 : f32 to vector<16x256xf32>
    %106 = arith.select %104, %102, %105 : vector<16x256xi1>, vector<16x256xf32>
    %107 = arith.addf %101, %106 : vector<16x256xf32>
    %c0_21 = arith.constant 0 : index
    %c0_22 = arith.constant 0 : index
    %108 = vector.load %arg3[%c0_21, %c0_22] : memref<16x256xf32, #tpu.memory_space<vmem>>, vector<16x256xf32>
    tpu.vector_store %arg3[%c0_21, %c0_22], %107 {strides = array<i32>} : memref<16x256xf32, #tpu.memory_space<vmem>>, vector<16x256xf32>,
    return
  }
  func.func @transform_0(%arg0: i32) -> (i32, i32) {
    %c0_i32 = arith.constant 0 : i32
    %c0_i32_0 = arith.constant 0 : i32
    return %arg0, %c0_i32 : i32, i32
  }
  func.func @transform_1(%arg0: i32) -> (i32, i32) {
    %c0_i32 = arith.constant 0 : i32
    %c0_i32_0 = arith.constant 0 : i32
    %c0_i32_1 = arith.constant 0 : i32
    return %c0_i32, %c0_i32_0 : i32, i32
  }
  func.func @transform_2(%arg0: i32) -> (i32, i32) {
    %c0_i32 = arith.constant 0 : i32
    %c0_i32_0 = arith.constant 0 : i32
    return %arg0, %c0_i32 : i32, i32
  }
}

</mosaic_0001>

<bundles_post_ra>
// kernel: tpu_custom_call.1
= control target key start
LH: loop header
LB: loop body
LE: loop exit
PB: predicated region body
PF: predicated region fallthrough
CT: control target
= control target key end

     0   :  { %7 = vsyncpa [#allocation4], 0  ;;  %s434_s0 = inlined_call_operand.hbm [shape: f32[8,256], index: 0, kind: input, shape index: {}]   ;;  %s435_s1 = inlined_call_operand.vmem [shape: f32[8,2], index: 1, kind: input, shape index: {}]   ;;  %s436_s2 = inlined_call_operand.hbm [shape: f32[16,256], index: 2, kind: output, shape index: {}]  }
   0x1   :  { %8 = vsyncpa [#allocation5], 0  ;;  %s14_s11 = sshll.u32 %s434_s0, 4  ;;  %s311_s12 = smov [#allocation3]   ;;  %s15_s11 = int_to_ptr.hbm [resolvable:$true] %s14_s11 }
   0x2   :  { %s16_s13 = sshll.u32 %s311_s12, 4  ;;  %s17_s13 = int_to_ptr.vmem [resolvable:$true] %s16_s13 }
   0x3   :  { %19 = dma.hbm_to_vmem [thread:$0]  %s15_s11, 256, %s17_s13, [#allocation4]  }
   0x4   :  { %307 = dma.done.wait [#allocation4], 256  }
   0x5   :  { %308 = vsyncadd [#allocation4], 4294967040  ;;  %v312_v0 = vmov 0   ;;  %v28_v1 = vld [vmem:[%s435_s1] sm:$0xff]  ;;  %v313_v2 = vmov 1   ;;  %v27_v5 = vld [vmem:[#allocation3 + $0x8] sm:$0xff]  ;;  %v90_v51 = vlaneseq }
   0x6   :  { %257 = vset.pattern.permute.xlu0 %v312_v0  ;;  %v26_v4 = vld [vmem:[#allocation3] sm:$0xff]  ;;  %v35_v7 = vperm.slane %v27_v5, 0  ;;  %v43_v10 = vperm.slane %v27_v5, 1  ;;  %v55_v12 = vperm.slane %v27_v5, 3  ;;  %v51_v13 = vperm.slane %v27_v5, 2  ;;  %s314_s0 = smov 1  }
   0x7   :  { %31 = vperm.xlu0 %257, %v28_v1   ;;  %v34_v6 = vperm.slane %v26_v4, 0  ;;  %v50_v8 = vperm.slane %v26_v4, 2  ;;  %v42_v9 = vperm.slane %v26_v4, 1  ;;  %v54_v11 = vperm.slane %v26_v4, 3  ;;  %s315_s1 = smov 127   ;;  %s316_s16 = smov 16  }
   0x8   :  { %v62_v14 = vperm.slane %v26_v4, 4  ;;  %v66_v15 = vperm.slane %v26_v4, 5  ;;  %v67_v16 = vperm.slane %v27_v5, 5  ;;  %v63_v17 = vperm.slane %v27_v5, 4  ;;  %s317_s17 = smov 112   ;;  %s235_s20 = sshll.u32 %s436_s2, 4  ;;  %s236_s20 = int_to_ptr.hbm [resolvable:$true] %s235_s20 }
   0x9   :  { %v74_v18 = vperm.slane %v26_v4, 6  ;;  %v75_v19 = vperm.slane %v27_v5, 6  ;;  %v78_v20 = vperm.slane %v26_v4, 7  ;;  %v79_v25 = vperm.slane %v27_v5, 7  ;;  %s318_s21 = smov [#allocation6]   ;;  %s319_s2 = smov 256  }
   0xa   :  { %v341_v52 = vand.u32 127, %v90_v51  ;;  %s233_s22 = sshll.u32 %s318_s21, 4  ;;  %s234_s22 = int_to_ptr.vmem [resolvable:$true] %s233_s22 }
   0xc   :  { %v344_v54 = vadd.s32 128, %v341_v52  ;;  %v97_v56 = vand.u32 15, %v341_v52  ;;  %vm133_vm0 = vcmp.lt.s32.totalorder %v341_v52, 1  ;;  %vm158_vm3 = vcmp.lt.s32.totalorder %v341_v52, 127 }
   0xd   :  { %vm183_vm6 = vcmp.lt.s32.totalorder %v341_v52, 16  ;;  %vm121_vm7 = vcmp.ge.s32.totalorder %v341_v52, 16  ;;  %vm208_vm8 = vcmp.lt.s32.totalorder %v341_v52, 112 }
   0xe   :  { %v104_v57 = vand.u32 15, %v344_v54  ;;  %vm349_vm1 = vcmp.ge.s32.totalorder %v97_v56, 1  ;;  %vm366_vm4 = vcmp.lt.s32.totalorder %v97_v56, 15  ;;  %vm124_vm9 = vcmp.lt.s32.totalorder %v344_v54, 240 }
   0xf   :  { %258 = vset.pattern.permute.xlu0 %v313_v2 }
  0x10   :  { %39 = vperm.xlu0 %258, %v28_v1   ;;  %vm353_vm2 = vcmp.ge.s32.totalorder %v104_v57, 1  ;;  %vm370_vm5 = vcmp.lt.s32.totalorder %v104_v57, 15 }
  0x79   :  { %v32_v3 = vpop.permute.xlu0 %31 }
  0x7a   :  { %v36_v21 = vmul.f32 %v34_v6, %v32_v3  ;;  %v37_v22 = vmul.f32 %v35_v7, %v32_v3  ;;  %v52_v23 = vmul.f32 %v50_v8, %v32_v3  ;;  %v53_v30 = vmul.f32 %v51_v13, %v32_v3 }
  0x7b   :  { %v64_v31 = vmul.f32 %v62_v14, %v32_v3  ;;  %v65_v38 = vmul.f32 %v63_v17, %v32_v3  ;;  %v76_v41 = vmul.f32 %v74_v18, %v32_v3  ;;  %v77_v43 = vmul.f32 %v75_v19, %v32_v3 }
  0x82   :  { %v40_v24 = vpop.permute.xlu0 %39 }
  0x83   :  { %v44_v26 = vmul.f32 %v42_v9, %v40_v24  ;;  %v45_v27 = vmul.f32 %v43_v10, %v40_v24  ;;  %v56_v28 = vmul.f32 %v54_v11, %v40_v24  ;;  %v57_v29 = vmul.f32 %v55_v12, %v40_v24 }
  0x84   :  { %v68_v32 = vmul.f32 %v66_v15, %v40_v24  ;;  %v69_v33 = vmul.f32 %v67_v16, %v40_v24  ;;  %v80_v37 = vmul.f32 %v78_v20, %v40_v24  ;;  %v81_v40 = vmul.f32 %v79_v25, %v40_v24 }
  0x85   :  { %v46_v34 = vadd.f32 %v44_v26, %v36_v21  ;;  %v47_v35 = vadd.f32 %v45_v27, %v37_v22  ;;  %v58_v36 = vadd.f32 %v56_v28, %v52_v23  ;;  %v59_v39 = vadd.f32 %v57_v29, %v53_v30 }
  0x86   :  { %v70_v42 = vadd.f32 %v68_v32, %v64_v31  ;;  %v71_v44 = vadd.f32 %v69_v33, %v65_v38  ;;  %v82_v45 = vadd.f32 %v80_v37, %v76_v41  ;;  %v83_v46 = vadd.f32 %v81_v40, %v77_v43 }
  0x87   :  { %48 = vst [vmem:[#allocation2 + $0x10] sm:$0xf] %v46_v34 }
  0x88   :  { %49 = vst [vmem:[#allocation2] sm:$0xf] %v47_v35 }
  0x89   :  { %60 = vst [vmem:[#allocation2 + $0x10] sm:$0xf0] %v58_v36 }
  0x8a   :  { %61 = vst [vmem:[#allocation2] sm:$0xf0] %v59_v39 }
  0x8b   :  { %72 = vst [vmem:[#allocation2 + $0x18] sm:$0xf] %v70_v42 }
  0x8c   :  { %73 = vst [vmem:[#allocation2 + $0x8] sm:$0xf] %v71_v44 }
  0x8d   :  { %84 = vst [vmem:[#allocation2 + $0x18] sm:$0xf0] %v82_v45 }
  0x8e   :  { %85 = vst [vmem:[#allocation2 + $0x8] sm:$0xf0] %v83_v46 }
  0x90   :  { %v86_v47 = vld [vmem:[#allocation2 + $0x10] sm:$0xff] }
  0x91   :  { %v87_v48 = vld [vmem:[#allocation2] sm:$0xff]  ;;  %125 = vrot.lane.b32.xlu1 %v86_v47, %s314_s0 }
  0x92   :  { %154 = vrot.lane.b32.xlu0 %v87_v48, %s315_s1  ;;  %129 = vrot.lane.b32.xlu2 %v87_v48, %s314_s0 }
  0x94   :  { %v88_v49 = vld [vmem:[#allocation2 + $0x18] sm:$0xff] }
  0x95   :  { %v89_v50 = vld [vmem:[#allocation2 + $0x8] sm:$0xff] }
  0x99   :  { %127 = vrot.lane.b32.xlu1 %v88_v49, %s314_s0 }
  0x9a   :  { %131 = vrot.lane.b32.xlu2 %v89_v50, %s314_s0 }
  0xa1   :  { %150 = vrot.lane.b32.xlu1 %v86_v47, %s315_s1 }
  0xa2   :  { %152 = vrot.lane.b32.xlu2 %v88_v49, %s315_s1 }
  0xa9   :  { %156 = vrot.lane.b32.xlu1 %v89_v50, %s315_s1 }
  0xec   :  { %v130_v55 = vpop.permute.xlu2 %129 }
  0xf4   :  { %v132_v63 = vpop.permute.xlu2 %131 }
  0xfc   :  { %v153_v18 = vpop.permute.xlu2 %152 }
 0x103   :  { %v126_v53 = vpop.permute.xlu1 %125 }
 0x104   :  { %v134_v61 = vsel %vm133_vm0, %v126_v53, %v130_v55  ;;  %v136_v62 = vsel %vm133_vm0, %v130_v55, %v126_v53  ;;  %v155_v4 = vpop.permute.xlu0 %154 }
 0x105   :  { %v142_v0 = vsel %vm349_vm1, %v136_v62, 0.0  ;;  %v143_v1 = vsel %vm353_vm2, %v134_v61, 0.0 }
 0x106   :  { %v146_v6 = vadd.f32 %v142_v0, %v86_v47  ;;  %v147_v7 = vadd.f32 %v143_v1, %v87_v48 }
 0x10b   :  { %v128_v58 = vpop.permute.xlu1 %127 }
 0x10c   :  { %v135_v12 = vsel %vm133_vm0, %v128_v58, %v132_v63  ;;  %v137_v13 = vsel %vm133_vm0, %v132_v63, %v128_v58 }
 0x10d   :  { %v144_v16 = vsel %vm349_vm1, %v137_v13, 0.0  ;;  %v145_v17 = vsel %vm353_vm2, %v135_v12, 0.0 }
 0x10e   :  { %v148_v20 = vadd.f32 %v144_v16, %v88_v49  ;;  %v149_v21 = vadd.f32 %v145_v17, %v89_v50 }
 0x113   :  { %v151_v5 = vpop.permute.xlu1 %150 }
 0x114   :  { %v159_v8 = vsel %vm158_vm3, %v151_v5, %v155_v4  ;;  %v161_v9 = vsel %vm158_vm3, %v155_v4, %v151_v5 }
 0x115   :  { %v167_v10 = vsel %vm366_vm4, %v159_v8, 0.0  ;;  %v168_v11 = vsel %vm370_vm5, %v161_v9, 0.0 }
 0x116   :  { %v171_v14 = vadd.f32 %v167_v10, %v146_v6  ;;  %v172_v15 = vadd.f32 %v168_v11, %v147_v7 }
 0x118   :  { %179 = vrot.lane.b32.xlu1 %v172_v15, %s316_s16  ;;  %175 = vrot.lane.b32.xlu2 %v171_v14, %s316_s16 }
 0x11b   :  { %v157_v19 = vpop.permute.xlu1 %156 }
 0x11c   :  { %v160_v22 = vsel %vm158_vm3, %v153_v18, %v157_v19  ;;  %v162_v23 = vsel %vm158_vm3, %v157_v19, %v153_v18 }
 0x11d   :  { %v169_v24 = vsel %vm366_vm4, %v160_v22, 0.0  ;;  %v170_v25 = vsel %vm370_vm5, %v162_v23, 0.0 }
 0x11e   :  { %v173_v26 = vadd.f32 %v169_v24, %v148_v20  ;;  %v174_v27 = vadd.f32 %v170_v25, %v149_v21 }
 0x120   :  { %181 = vrot.lane.b32.xlu2 %v174_v27, %s316_s16  ;;  %202 = vrot.lane.b32.xlu1 %v173_v26, %s317_s17 }
 0x121   :  { %177 = vrot.lane.b32.xlu0 %v173_v26, %s316_s16 }
 0x128   :  { %204 = vrot.lane.b32.xlu2 %v172_v15, %s317_s17 }
 0x129   :  { %200 = vrot.lane.b32.xlu0 %v171_v14, %s317_s17 }
 0x131   :  { %206 = vrot.lane.b32.xlu0 %v174_v27, %s317_s17 }
 0x172   :  { %v176_v28 = vpop.permute.xlu2 %175 }
 0x17a   :  { %v182_v29 = vpop.permute.xlu2 %181 }
 0x182   :  { %v205_v35 = vpop.permute.xlu2 %204 }
 0x18a   :  { %v180_v30 = vpop.permute.xlu1 %179 }
 0x18b   :  { %v186_v32 = vsel %vm183_vm6, %v180_v30, %v176_v28  ;;  %v184_v34 = vsel %vm183_vm6, %v176_v28, %v180_v30 }
 0x18c   :  { %v192_v33 = vsel %vm121_vm7, %v186_v32, 0.0  ;;  %v197_v38 = vadd.f32 %v184_v34, %v172_v15 }
 0x18d   :  { %v196_v36 = vadd.f32 %v192_v33, %v171_v14 }
 0x192   :  { %v203_v48 = vpop.permute.xlu1 %202 }
 0x193   :  { %v178_v31 = vpop.permute.xlu0 %177 }
 0x194   :  { %v187_v41 = vsel %vm183_vm6, %v182_v29, %v178_v31  ;;  %v185_v46 = vsel %vm183_vm6, %v178_v31, %v182_v29 }
 0x195   :  { %v194_v45 = vsel %vm121_vm7, %v187_v41, 0.0  ;;  %v199_v50 = vadd.f32 %v185_v46, %v174_v27 }
 0x196   :  { %v198_v47 = vadd.f32 %v194_v45, %v173_v26 }
 0x19b   :  { %v201_v37 = vpop.permute.xlu0 %200 }
 0x19c   :  { %v209_v39 = vsel %vm208_vm8, %v201_v37, %v205_v35  ;;  %v211_v40 = vsel %vm208_vm8, %v205_v35, %v201_v37 }
 0x19d   :  { %v218_v42 = vsel %vm124_vm9, %v211_v40, 0.0  ;;  %v221_v43 = vadd.f32 %v209_v39, %v196_v36 }
 0x19e   :  { %v222_v44 = vadd.f32 %v218_v42, %v197_v38 }
 0x19f   :  { %225 = vst [vmem:[#allocation6] sm:$0xff] %v221_v43 }
 0x1a0   :  { %226 = vst [vmem:[#allocation6 + $0x8] sm:$0xff] %v222_v44 }
 0x1a3   :  { %v207_v49 = vpop.permute.xlu0 %206 }
 0x1a4   :  { %v210_v51 = vsel %vm208_vm8, %v203_v48, %v207_v49  ;;  %v212_v53 = vsel %vm208_vm8, %v207_v49, %v203_v48 }
 0x1a5   :  { %v220_v55 = vsel %vm124_vm9, %v212_v53, 0.0  ;;  %v223_v56 = vadd.f32 %v210_v51, %v198_v47 }
 0x1a6   :  { %v224_v57 = vadd.f32 %v220_v55, %v199_v50 }
 0x1a7   :  { %227 = vst [vmem:[#allocation6 + $0x10] sm:$0xff] %v223_v56 }
 0x1a8   :  { %228 = vst [vmem:[#allocation6 + $0x18] sm:$0xff] %v224_v57 }
 0x1a9   :  { %241 = dma.vmem_to_hbm [thread:$0]  %s234_s22, 512, %s236_s20, [#allocation5], %s319_s2, %s319_s2, %s316_s16  }
 0x1aa   :  { %309 = dma.done.wait [#allocation5], 512  }
 0x1ab   :  { %310 = vsyncadd [#allocation5], 4294966784 }
 0x1ac   :  { %246 = vsyncpa [#allocation4], 1 }
 0x1ad   :  { %247 = vsyncpa [#allocation5], 1 }

</bundles_post_ra>
